<compile_context>
chip_gen: v7x
topology: tpu7x:2x2x1
jax: 0.10.0
libtpu: 0.0.40
codegen_flags: <defaults>
</compile_context>

<pallas_src>
import math

import jax
import jax.numpy as jnp
from jax.experimental import pallas as pl
from jax.experimental.pallas import tpu as pltpu


def _sinusoidal_kernel(wp_ref, x_ref, o_ref):
    # wp_ref: (k+1, L) resident constants, L = k*dim.
    #         Rows 0..k-1: block-diagonal frequency rows (row j holds
    #         [f_0..f_{h-1}, f_0..f_{h-1}] in lanes [j*dim, (j+1)*dim),
    #         zeros elsewhere).
    #         Row k: phase row ([0]*half + [pi/2]*half) tiled k times.
    # x_ref:  (TB, k)  -- k packed timesteps per output row.
    # o_ref:  (TB, L)  -- lane-dense output tile (single full-width store).
    k = x_ref.shape[-1]                                   # static Python int
    acc = x_ref[:, 0:1] * wp_ref[0:1, :]                  # (TB, L) broadcast mul
    for j in range(1, k):                                 # small static unroll
        acc = acc + x_ref[:, j:j + 1] * wp_ref[j:j + 1, :]
    # cos(z) == sin(z + pi/2): one transcendental per element.
    o_ref[...] = jnp.sin(acc + wp_ref[k:k + 1, :]).astype(o_ref.dtype)


def sinusoidal_pos_emb(x, dim, *, block_rows=2048, out_dtype=jnp.float32):
    """x: (B,) timesteps -> (B, dim) sinusoidal embedding (matches the nn.Module)."""
    assert dim % 2 == 0 and dim >= 4
    B = x.shape[0]
    half = dim // 2

    # ---- constants (hoisted out of the kernel) ------------------------------
    scale = math.log(10000.0) / (half - 1)
    freqs = jnp.exp(-scale * jnp.arange(half, dtype=jnp.float32))        # (half,)
    freqs_full = jnp.concatenate([freqs, freqs])                          # (dim,)
    phase_full = jnp.concatenate(
        [jnp.zeros((half,), jnp.float32),
         jnp.full((half,), jnp.pi / 2, jnp.float32)])                     # (dim,)

    # ---- lane packing: k timesteps per output row so k*dim is 128-dense -----
    if dim < 128 and 128 % dim == 0:
        k = 128 // dim
    else:
        k = 1
        # TODO(synk): dims that are neither 128-aligned nor divisors of 128 still
        # hit masked partial stores; the production answer is fusing this op into
        # the consuming time-MLP kernel.
    L = k * dim

    wf = jnp.kron(jnp.eye(k, dtype=jnp.float32), freqs_full[None, :])     # (k, L)
    wp = jnp.concatenate([wf, jnp.tile(phase_full, k)[None, :]], axis=0)  # (k+1, L)

    # ---- row tiling ----------------------------------------------------------
    rows = -(-B // k)
    rows8 = max(8, (-(-rows // 8)) * 8)
    tb = min(block_rows, rows8)
    if rows8 >= 16:
        # v7x: guarantee >= 2 grid steps so the ("parallel",) axis spans both TCs.
        tb = min(tb, max(8, (rows8 // 2) // 8 * 8))
    # Keep the double-buffered output tile under ~12 MiB (v5e scoped-VMEM safe,
    # comfortably inside v6e 32 MiB scoped / v7x 64 MiB physical).
    out_itemsize = jnp.dtype(out_dtype).itemsize
    vmem_rows = max(8, ((12 * 2 ** 20) // (2 * L * out_itemsize)) // 8 * 8)
    tb = max(8, (min(tb, vmem_rows) // 8) * 8)
    rows_pad = (-(-rows8 // tb)) * tb
    total = rows_pad * k

    xf = x.astype(jnp.float32).reshape(-1)
    if total != B:
        xf = jnp.pad(xf, (0, total - B))
    x_rows = xf.reshape(rows_pad, k)

    out = pl.pallas_call(
        _sinusoidal_kernel,
        out_shape=jax.ShapeDtypeStruct((rows_pad, L), out_dtype),
        grid_spec=pltpu.PrefetchScalarGridSpec(
            num_scalar_prefetch=0,
            grid=(rows_pad // tb,),
            in_specs=[
                # Resident freq+phase constant block (same index every step).
                pl.BlockSpec((k + 1, L), lambda i: (0, 0)),
                # Per-tile packed timesteps.
                pl.BlockSpec((tb, k), lambda i: (i, 0)),
            ],
            out_specs=pl.BlockSpec((tb, L), lambda i: (i, 0)),
        ),
        compiler_params=pltpu.CompilerParams(
            dimension_semantics=("parallel",)),
        cost_estimate=pl.CostEstimate(
            flops=rows_pad * L * (2 * k + 1),
            transcendentals=rows_pad * L,
            bytes_accessed=rows_pad * (L * out_itemsize + k * 4)
                           + (k + 1) * L * 4),
    )(wp, x_rows)

    out = out.reshape(rows_pad * k, dim)          # free row-major view
    # TODO(synk): when padding occurred this slice is an extra HBM copy; keep B a
    # multiple of 8*k in production (or fuse into the consumer) so it is a no-op.
    return out[:B] if total != B else out


def _reference(x, dim):
    half = dim // 2
    scale = math.log(10000.0) / (half - 1)
    freqs = jnp.exp(-scale * jnp.arange(half, dtype=jnp.float32))
    emb = x.astype(jnp.float32)[:, None] * freqs[None, :]
    return jnp.concatenate([jnp.sin(emb), jnp.cos(emb)], axis=-1)


if __name__ == "__main__":
    key = jax.random.PRNGKey(0)

    # Small diffusion-timestep config (packed lane-dense path, k = 4).
    B, dim = 8, 32
    x = jax.random.randint(key, (B,), 0, 1000).astype(jnp.float32)
    out = jax.block_until_ready(sinusoidal_pos_emb(x, dim))
    ref = _reference(x, dim)
    assert out.shape == (B, dim), out.shape
    assert out.dtype == jnp.float32
    max_err = float(jnp.max(jnp.abs(out - ref)))
    # Tolerance covers f32 sin range reduction for arguments up to ~1e3 plus the
    # f32-rounded pi/2 phase shift used for the cos half.
    assert jnp.allclose(out, ref, atol=1e-3, rtol=1e-3), f"max_err={max_err}"

    # Unpacked path (k = 1, multi-step parallel grid).
    B2, dim2 = 16, 128
    x2 = jax.random.randint(jax.random.PRNGKey(1), (B2,), 0, 1000).astype(jnp.float32)
    out2 = jax.block_until_ready(sinusoidal_pos_emb(x2, dim2))
    ref2 = _reference(x2, dim2)
    assert out2.shape == (B2, dim2), out2.shape
    max_err2 = float(jnp.max(jnp.abs(out2 - ref2)))
    assert jnp.allclose(out2, ref2, atol=1e-3, rtol=1e-3), f"max_err={max_err2}"

    print("KERNEL_OK")
</pallas_src>

<mosaic_0001>
module attributes {stable_mosaic.version = 11 : i64} {
  func.func @_sinusoidal_kernel(%arg0: i32, %arg1: memref<5x128xf32, #tpu.memory_space<vmem>>, %arg2: memref<8x4xf32, #tpu.memory_space<vmem>>, %arg3: memref<8x128xf32, #tpu.memory_space<vmem>>) attributes {dimension_semantics = [#tpu.dimension_semantics<parallel>], iteration_bounds = array<i64: 1>, scalar_prefetch = 0 : i64, scratch_operands = 0 : i64, tpu.core_type = #tpu.core_type<tc>, window_params = [{pipeline_mode = #tpu.pipeline_mode<synchronous>, transform_indices = @transform_0, window_bounds = array<i64: 5, 128>}, {transform_indices = @transform_1, window_bounds = array<i64: 8, 4>}, {transform_indices = @transform_2, window_bounds = array<i64: 8, 128>}]} {
    %c0 = arith.constant 0 : index
    %c0_0 = arith.constant 0 : index
    %0 = vector.load %arg2[%c0, %c0_0] : memref<8x4xf32, #tpu.memory_space<vmem>>, vector<8x1xf32>
    %c0_1 = arith.constant 0 : index
    %c0_2 = arith.constant 0 : index
    %1 = vector.load %arg1[%c0_1, %c0_2] : memref<5x128xf32, #tpu.memory_space<vmem>>, vector<1x128xf32>
    %2 = vector.broadcast %0 : vector<8x1xf32> to vector<8x128xf32>
    %3 = vector.broadcast %1 : vector<1x128xf32> to vector<8x128xf32>
    %4 = arith.mulf %2, %3 : vector<8x128xf32>
    %c0_3 = arith.constant 0 : index
    %c1 = arith.constant 1 : index
    %5 = vector.load %arg2[%c0_3, %c1] : memref<8x4xf32, #tpu.memory_space<vmem>>, vector<8x1xf32>
    %c1_4 = arith.constant 1 : index
    %c0_5 = arith.constant 0 : index
    %6 = vector.load %arg1[%c1_4, %c0_5] : memref<5x128xf32, #tpu.memory_space<vmem>>, vector<1x128xf32>
    %7 = vector.broadcast %5 : vector<8x1xf32> to vector<8x128xf32>
    %8 = vector.broadcast %6 : vector<1x128xf32> to vector<8x128xf32>
    %9 = arith.mulf %7, %8 : vector<8x128xf32>
    %10 = arith.addf %4, %9 : vector<8x128xf32>
    %c0_6 = arith.constant 0 : index
    %c2 = arith.constant 2 : index
    %11 = vector.load %arg2[%c0_6, %c2] : memref<8x4xf32, #tpu.memory_space<vmem>>, vector<8x1xf32>
    %c2_7 = arith.constant 2 : index
    %c0_8 = arith.constant 0 : index
    %12 = vector.load %arg1[%c2_7, %c0_8] : memref<5x128xf32, #tpu.memory_space<vmem>>, vector<1x128xf32>
    %13 = vector.broadcast %11 : vector<8x1xf32> to vector<8x128xf32>
    %14 = vector.broadcast %12 : vector<1x128xf32> to vector<8x128xf32>
    %15 = arith.mulf %13, %14 : vector<8x128xf32>
    %16 = arith.addf %10, %15 : vector<8x128xf32>
    %c0_9 = arith.constant 0 : index
    %c3 = arith.constant 3 : index
    %17 = vector.load %arg2[%c0_9, %c3] : memref<8x4xf32, #tpu.memory_space<vmem>>, vector<8x1xf32>
    %c3_10 = arith.constant 3 : index
    %c0_11 = arith.constant 0 : index
    %18 = vector.load %arg1[%c3_10, %c0_11] : memref<5x128xf32, #tpu.memory_space<vmem>>, vector<1x128xf32>
    %19 = vector.broadcast %17 : vector<8x1xf32> to vector<8x128xf32>
    %20 = vector.broadcast %18 : vector<1x128xf32> to vector<8x128xf32>
    %21 = arith.mulf %19, %20 : vector<8x128xf32>
    %22 = arith.addf %16, %21 : vector<8x128xf32>
    %c4 = arith.constant 4 : index
    %c0_12 = arith.constant 0 : index
    %23 = vector.load %arg1[%c4, %c0_12] : memref<5x128xf32, #tpu.memory_space<vmem>>, vector<1x128xf32>
    %24 = vector.broadcast %23 : vector<1x128xf32> to vector<8x128xf32>
    %25 = arith.addf %22, %24 : vector<8x128xf32>
    %26 = math.sin %25 : vector<8x128xf32>
    %c0_13 = arith.constant 0 : index
    %c0_14 = arith.constant 0 : index
    %27 = vector.load %arg3[%c0_13, %c0_14] : memref<8x128xf32, #tpu.memory_space<vmem>>, vector<8x128xf32>
    tpu.vector_store %arg3[%c0_13, %c0_14], %26 {strides = array<i32>} : memref<8x128xf32, #tpu.memory_space<vmem>>, vector<8x128xf32>,
    return
  }
  func.func @transform_0(%arg0: i32) -> (i32, i32) {
    %c0_i32 = arith.constant 0 : i32
    %c0_i32_0 = arith.constant 0 : i32
    %c0_i32_1 = arith.constant 0 : i32
    return %c0_i32, %c0_i32_0 : i32, i32
  }
  func.func @transform_1(%arg0: i32) -> (i32, i32) {
    %c0_i32 = arith.constant 0 : i32
    %c0_i32_0 = arith.constant 0 : i32
    return %arg0, %c0_i32 : i32, i32
  }
  func.func @transform_2(%arg0: i32) -> (i32, i32) {
    %c0_i32 = arith.constant 0 : i32
    %c0_i32_0 = arith.constant 0 : i32
    return %arg0, %c0_i32 : i32, i32
  }
}

</mosaic_0001>

<bundles_post_ra>
// kernel: tpu_custom_call.1
= control target key start
LH: loop header
LB: loop body
LE: loop exit
PB: predicated region body
PF: predicated region fallthrough
CT: control target
= control target key end

     0   :  { %v239_v1 = vmov 0   ;;  %v240_v2 = vmov 2   ;;  %s316_s0 = inlined_call_operand.vmem [shape: f32[5,128], index: 0, kind: input, shape index: {}]   ;;  %s317_s1 = inlined_call_operand.vmem [shape: f32[8,4], index: 1, kind: input, shape index: {}]   ;;  %s318_s2 = inlined_call_operand.hbm [shape: f32[8,128], index: 2, kind: output, shape index: {}]  }
   0x1   :  { %v12_v0 = vld [vmem:[%s317_s1] sm:$0xff]  ;;  %206 = vset.pattern.permute.xlu0 %v239_v1  ;;  %208 = vset.pattern.permute.xlu1 %v240_v2 }
   0x2   :  { %7 = vsyncpa [#allocation3], 0  ;;  %16 = vperm.xlu0 %206, %v12_v0   ;;  %37 = vperm.xlu1 %208, %v12_v0   ;;  %v241_v3 = vmov 1   ;;  %v242_v4 = vmov 3   ;;  %v182_v7 = vld [vmem:[%s316_s0] ss:$0 sm:$0xff] }
   0x3   :  { %v183_v8 = vld [vmem:[%s316_s0 + $0x1] ss:$0 sm:$0xff]  ;;  %v184_v9 = vld [vmem:[%s316_s0 + $0x2] ss:$0 sm:$0xff]  ;;  %v185_v11 = vld [vmem:[%s316_s0 + $0x3] ss:$0 sm:$0xff] }
   0x4   :  { %v186_v19 = vld [vmem:[%s316_s0 + $0x4] ss:$0 sm:$0xff]  ;;  %v243_v32 = vmov 683565275   ;;  %v244_v34 = vmov 2475754826  }
   0x5   :  { %v245_v37 = vmov 2131351028   ;;  %v246_v40 = vmov 2102212464   ;;  %v247_v43 = vmov 920167782  }
   0x6   :  { %207 = vset.pattern.permute.xlu0 %v241_v3  ;;  %209 = vset.pattern.permute.xlu1 %v242_v4  ;;  %v248_v46 = vmov 1326507024   ;;  %s249_s0 = smov [#allocation2]  }
   0x7   :  { %26 = vperm.xlu0 %207, %v12_v0   ;;  %48 = vperm.xlu1 %209, %v12_v0   ;;  %s174_s20 = sshll.u32 %s249_s0, 4  ;;  %s175_s20 = int_to_ptr.vmem [resolvable:$true] %s174_s20 }
   0x8   :  { %s215_s21 = scalar_lea.vmem %s175_s20, 128  ;;  %p220_p1 = scmp.lt.s32.totalorder %s175_s20, %s175_s20 }
   0x9   :  { %p216_p0 = scmp.ne.s32.totalorder %s175_s20, %s215_s21  ;;  %p221_p2 = scmp.lt.s32.totalorder %s215_s21, %s215_s21 }
   0xb   :  { %210 = vset.pattern.permute.xlu0 %v242_v4  ;;  %p222_p3 = por %p221_p2, %p220_p1 }
   0xd   :  { %p223_p4 = pnand %p222_p3, %p216_p0 }
  0x81   :  { %v17_v5 = vpop.permute.xlu0 %16  ;;  %v38_v6 = vpop.permute.xlu1 %37 }
  0x82   :  { %v23_v13 = vmul.f32 %v182_v7, %v17_v5  ;;  %v44_v15 = vmul.f32 %v184_v9, %v38_v6 }
  0x86   :  { %v27_v10 = vpop.permute.xlu0 %26  ;;  %v49_v12 = vpop.permute.xlu1 %48 }
  0x87   :  { %v33_v14 = vmul.f32 %v183_v8, %v27_v10  ;;  %v55_v17 = vmul.f32 %v185_v11, %v49_v12 }
  0x89   :  { %v34_v16 = vadd.f32 %v33_v14, %v23_v13 }
  0x8b   :  { %v45_v18 = vadd.f32 %v44_v15, %v34_v16 }
  0x8d   :  { %v56_v20 = vadd.f32 %v55_v17, %v45_v18 }
  0x8f   :  { %v283_v21 = vadd.f32 %v186_v19, %v56_v20 }
  0x91   :  { %v66_v22 = vand.u32 2139095040, %v283_v21  ;;  %v63_v26 = vand.u32 2147483647, %v283_v21  ;;  %vm65_vm7 = vcmp.lt.s32.totalorder %v283_v21, 0  ;;  %vm155_vm12 = vweird.f32 %v283_v21 }
  0x93   :  { %v67_v23 = vshrl.u32 %v66_v22, 23  ;;  %v70_v30 = vand.u32 8388607, %v63_v26  ;;  %vm64_vm8 = vcmp.le.f32.partialorder %v63_v26, 0.7853982 }
  0x95   :  { %v187_v24 = vadd.s32 4294967169, %v67_v23  ;;  %v71_v48 = vor.u32 8388608, %v70_v30 }
  0x97   :  { %v73_v25 = vadd.s32 1, %v187_v24  ;;  %v111_v62 = vshll.u32 %v71_v48, 8 }
  0x99   :  { %vm74_vm0 = vcmp.gt.s32.totalorder %v73_v25, 0 }
  0x9a   :  { %v75_v27 = vsel %vm74_vm0, %v73_v25, 0 }
  0x9b   :  { %v77_v28 = vand.u32 31, %v75_v27  ;;  %v76_v31 = vshrl.u32 %v75_v27, 5 }
  0x9d   :  { %v78_v29 = vsub.s32 32, %v77_v28  ;;  %v80_v33 = vshll.u32 %v243_v32, %v77_v28  ;;  %v83_v35 = vshll.u32 %v244_v34, %v77_v28  ;;  %v86_v39 = vshll.u32 %v245_v37, %v77_v28 }
  0x9e   :  { %v89_v42 = vshll.u32 %v246_v40, %v77_v28  ;;  %v92_v45 = vshll.u32 %v247_v43, %v77_v28  ;;  %vm95_vm1 = vcmp.lt.s32.totalorder %v76_v31, 1  ;;  %vm98_vm2 = vcmp.lt.s32.totalorder %v76_v31, 4 }
  0x9f   :  { %v81_v36 = vshrl.u32 %v244_v34, %v78_v29  ;;  %v84_v38 = vshrl.u32 %v245_v37, %v78_v29  ;;  %v87_v41 = vshrl.u32 %v246_v40, %v78_v29  ;;  %v90_v44 = vshrl.u32 %v247_v43, %v78_v29 }
  0xa0   :  { %v93_v47 = vshrl.u32 %v248_v46, %v78_v29  ;;  %v79_v57 = vshrl.u32 %v243_v32, %v78_v29  ;;  %vm97_vm3 = vcmp.lt.s32.totalorder %v76_v31, 3  ;;  %vm96_vm4 = vcmp.lt.s32.totalorder %v76_v31, 2 }
  0xa1   :  { %v82_v49 = vor.u32 %v81_v36, %v80_v33  ;;  %v85_v50 = vor.u32 %v84_v38, %v83_v35  ;;  %v88_v51 = vor.u32 %v87_v41, %v86_v39  ;;  %v91_v52 = vor.u32 %v90_v44, %v89_v42 }
  0xa2   :  { %v94_v53 = vor.u32 %v93_v47, %v92_v45 }
  0xa3   :  { %v100_v54 = vsel %vm98_vm2, %v88_v51, 2102212464  ;;  %v103_v55 = vsel %vm95_vm1, %v82_v49, %v85_v50  ;;  %v107_v56 = vsel %vm95_vm1, %v85_v50, %v88_v51  ;;  %v104_v58 = vsel %vm98_vm2, %v91_v52, 920167782 }
  0xa4   :  { %v108_v59 = vsel %vm98_vm2, %v94_v53, 1326507024  ;;  %v105_v60 = vsel %vm97_vm3, %v88_v51, %v104_v58  ;;  %v99_v63 = vsel %vm95_vm1, %v79_v57, %v82_v49  ;;  %v101_v0 = vsel %vm97_vm3, %v85_v50, %v100_v54 }
  0xa5   :  { %v109_v61 = vsel %vm97_vm3, %v91_v52, %v108_v59  ;;  %v106_v1 = vsel %vm96_vm4, %v103_v55, %v105_v60  ;;  %v102_v7 = vsel %vm96_vm4, %v99_v63, %v101_v0 }
  0xa6   :  { %v110_v2 = vsel %vm96_vm4, %v107_v56, %v109_v61  ;;  %v292_v5 = vmul.u32.u64.low %v111_v62, %v106_v1  ;;  %v293_v6 = vmul.u32.u64.high %v111_v62, %v106_v1, %v292_v5  ;;  %v118_v9 = vmul.u32 %v111_v62, %v102_v7 }
  0xa7   :  { %v289_v3 = vmul.u32.u64.low %v111_v62, %v110_v2  ;;  %v290_v4 = vmul.u32.u64.high %v111_v62, %v110_v2, %v289_v3 }
  0xa8   :  { %v121_v8 = vadd.s32 1, %v293_v6 }
  0xa9   :  { %vm120_vm5 = vc.u32 %v290_v4, %v292_v5  ;;  %v119_v22 = vadd.s32 %v292_v5, %v290_v4 }
  0xaa   :  { %v122_v10 = vsel %vm120_vm5, %v121_v8, %v293_v6 }
  0xab   :  { %v123_v11 = vadd.s32 %v122_v10, %v118_v9 }
  0xad   :  { %v124_v12 = vadd.s32 536870912, %v123_v11 }
  0xaf   :  { %v125_v13 = vshrl.u32 %v124_v12, 30 }
  0xb1   :  { %v126_v14 = vshll.u32 %v125_v13, 30  ;;  %v149_v35 = vsub.s32 4, %v125_v13 }
  0xb3   :  { %v127_v15 = vsub.s32 %v123_v11, %v126_v14  ;;  %v150_v38 = vsel %vm65_vm7, %v149_v35, %v125_v13 }
  0xb4   :  { %v152_v40 = vsel %vm64_vm8, 0, %v150_v38 }
  0xb5   :  { %v129_v16 = vsub.s32 0, %v127_v15  ;;  %v156_v41 = vadd.s32 3, %v152_v40 }
  0xb7   :  { %v188_v17 = vmin.u32 %v129_v16, %v127_v15  ;;  %v157_v42 = vand.u32 3, %v156_v41 }
  0xb9   :  { %v131_v18 = vclz %v188_v17  ;;  %vm162_vm9 = vcmp.eq.s32.totalorder %v157_v42, 2  ;;  %vm159_vm10 = vcmp.eq.s32.totalorder %v157_v42, 0  ;;  %vm158_vm11 = vcmp.lt.s32.totalorder %v157_v42, 2 }
  0xbb   :  { %v189_v19 = vadd.s32 4294967294, %v131_v18 }
  0xbd   :  { %vm190_vm6 = vcmp.lt.s32.totalorder %v189_v19, 0 }
  0xbe   :  { %v134_v20 = vsel %vm190_vm6, 0, %v189_v19 }
  0xbf   :  { %v135_v23 = vsub.s32 32, %v134_v20  ;;  %v139_v24 = vsub.s32 4294967266, %v134_v20  ;;  %v136_v25 = vshll.u32 %v127_v15, %v134_v20 }
  0xc1   :  { %v137_v27 = vshrl.u32 %v119_v22, %v135_v23  ;;  %v140_v28 = vadd.s32 127, %v139_v24 }
  0xc3   :  { %v138_v29 = vor.u32 %v137_v27, %v136_v25  ;;  %v141_v30 = vshll.u32 %v140_v28, 23 }
  0xc5   :  { %v142_v31 = vor.u32 4788187, %v141_v30  ;;  %v145_v33 = vcvt.s32.f32 %v138_v29 }
  0xc7   :  { %v143_v32 = vand.u32 2147483647, %v142_v31 }
  0xc9   :  { %v146_v34 = vmul.f32 %v145_v33, %v143_v32 }
  0xcb   :  { %v147_v36 = vxor.u32 2147483648, %v146_v34 }
  0xcd   :  { %v148_v37 = vsel %vm65_vm7, %v147_v36, %v146_v34 }
  0xce   :  { %v151_v39 = vsel %vm64_vm8, %v283_v21, %v148_v37 }
  0xcf   :  { %211 = vcosq.f32 %v151_v39 }
  0xd0   :  { %213 = vsinq.f32 %v151_v39 }
  0xd9   :  { %v212_v43 = vpop.eup %211 }
  0xda   :  { %v214_v44 = vpop.eup %213  ;;  %v163_v45 = vxor.u32 2147483648, %v212_v43 }
  0xdb   :  { %v160_v46 = vxor.u32 2147483648, %v214_v44 }
  0xdc   :  { %v164_v47 = vsel %vm162_vm9, %v163_v45, %v214_v44 }
  0xdd   :  { %v161_v26 = vsel %vm159_vm10, %v212_v43, %v160_v46 }
  0xde   :  { %v165_v48 = vsel %vm158_vm11, %v161_v26, %v164_v47 }
  0xdf   :  { %v166_v49 = vsel %vm155_vm12, nan, %v165_v48 }
  0xe0   :  { %167 = vst [vmem:[#allocation2] sm:$0xff] %v166_v49 }
  0xe1   :  { %226 = shalt.err (!%p223_p4)
}
  0xe2   :  { %s227_s24 = scalar_lea.hbm %s318_s2, 128 }
  0xe3   :  { %p228_p5 = scmp.ne.s32.totalorder %s318_s2, %s227_s24  ;;  %p231_p6 = scmp.lt.u32.totalorder %s227_s24, %s318_s2 }
  0xe5   :  { %p233_p7 = pnand %p231_p6, %p228_p5 }
  0xe7   :  { %236 = shalt.err (!%p233_p7)
}
  0xe8   :  { %177 = dma.vmem_to_hbm [thread:$0]  %s175_s20, 128, %s318_s2, [#allocation3]  }
  0xe9   :  { %237 = dma.done.wait [#allocation3], 128  }
  0xea   :  { %238 = vsyncadd [#allocation3], 4294967168 }
  0xeb   :  { %181 = vsyncpa [#allocation3], 1 }

</bundles_post_ra>
